<compile_context>
chip_gen: v5e
topology: v5e:2x2
jax: 0.10.0
libtpu: 0.0.40
codegen_flags: <defaults>
</compile_context>

<pallas_src>
import functools

import jax
import jax.numpy as jnp
from jax import lax
from jax.experimental import pallas as pl
from jax.experimental.pallas import tpu as pltpu

EPS = 1e-5          # torch.nn.GroupNorm default eps
NEG_SLOPE = 0.2     # LeakyReLU negative slope


def _pad8(n):
    return -(-n // 8) * 8


def _leaky_relu(y):
    return jnp.where(y >= 0, y, NEG_SLOPE * y)


def _groupnorm(y, gamma, beta):
    """GroupNorm(num_groups=1) over the whole per-sample tile, two-pass stats."""
    mean = jnp.mean(y, keepdims=True)                        # (1, 1)
    var = jnp.mean(jnp.square(y - mean), keepdims=True)      # biased var
    return (y - mean) * lax.rsqrt(var + EPS) * gamma + beta


# --------------------------- fused IRB kernel ---------------------------------
def irb_fused_kernel(x_ref, p_ref, w_ref, m_ref, o_ref, *,
                     H, W, C_in, B, C_out, shortcut, offs, w3_row):
    HW = H * W
    C_in_p, B_p, C_out_p = _pad8(C_in), _pad8(B), _pad8(C_out)

    # ---- grid-invariant setup, hoisted out of the per-sample loop -----------
    p = p_ref[...]                                   # (K, 1) packed params
    wslab = w_ref[...]                               # packed, zero-padded weights
    w1 = wslab[0:B_p, 0:C_in_p]                      # (B_p, C_in_p)
    w3 = wslab[w3_row:w3_row + C_out_p, 0:B_p]       # (C_out_p, B_p)

    def vec(name, n):                                # (n, 1): broadcasts on lanes
        o = offs[name]
        return p[o:o + n]

    g1, b1 = vec("g1", B), vec("b1", B)
    g2, b2 = vec("g2", B), vec("b2", B)
    g3, b3 = vec("g3", C_out), vec("b3", C_out)
    dwb = vec("dw_b", B)
    taps = [vec("tap%d" % k, B) for k in range(9)]   # 9 x (B, 1) depthwise taps

    m = m_ref[...]                                   # (4, HW) edge masks (f32)

    def edge(i):
        return jnp.broadcast_to(m[i:i + 1, :], (B, HW)) > 0.5

    at_l, at_r, at_t, at_b = edge(0), edge(1), edge(2), edge(3)
    up, dn = W, HW - W                               # non-negative lane shifts

    nb = x_ref.shape[0]
    for s in range(nb):                              # static unroll over samples
        xk = x_ref[s]                                # (C_in_p, HW), zero-padded

        # ---- stage 1: 1x1 conv (MXU) -> GN -> LeakyReLU ----------------------
        y = jnp.dot(w1, xk, preferred_element_type=jnp.float32)   # (B_p, HW)
        if B_p != B:
            y = y[0:B]
        y = _leaky_relu(_groupnorm(y, g1, b1))

        # ---- stage 2: depthwise 3x3, reflect pad via lane rolls --------------
        acc = jnp.broadcast_to(dwb, (B, HW))
        for dh in range(3):
            if dh == 0:      # reflected row h-1
                v = jnp.where(at_t, pltpu.roll(y, shift=dn, axis=1),
                              pltpu.roll(y, shift=up, axis=1))
            elif dh == 1:    # row h
                v = y
            else:            # reflected row h+1
                v = jnp.where(at_b, pltpu.roll(y, shift=up, axis=1),
                              pltpu.roll(y, shift=dn, axis=1))
            v_m = pltpu.roll(v, shift=1, axis=1)        # value at w-1 (interior)
            v_p = pltpu.roll(v, shift=HW - 1, axis=1)   # value at w+1 (interior)
            acc = acc + jnp.where(at_l, v_p, v_m) * taps[3 * dh + 0]
            acc = acc + v * taps[3 * dh + 1]
            acc = acc + jnp.where(at_r, v_m, v_p) * taps[3 * dh + 2]
        y2 = _leaky_relu(_groupnorm(acc, g2, b2))

        # ---- stage 3: 1x1 conv (MXU) -> GN -> (+ residual) -------------------
        if B_p != B:
            y2 = jnp.concatenate(
                [y2, jnp.zeros((B_p - B, HW), jnp.float32)], axis=0)
        z = jnp.dot(w3, y2, preferred_element_type=jnp.float32)   # (C_out_p, HW)
        if C_out_p != C_out:
            z = z[0:C_out]
        z = _groupnorm(z, g3, b3)
        if shortcut:
            z = z + xk[0:C_in]
        o_ref[s] = z


# ------------------------------ host-side packing ------------------------------
def _pack_params(params):
    """Pack all per-channel vectors + depthwise taps into one (K, 1) f32 slab."""
    B = params["dw_w"].shape[0]
    dw9 = params["dw_w"].reshape(B, 9)               # [c, 3*dh + dw]
    segs = [("g1", params["g1"]), ("b1", params["b1"]), ("dw_b", params["dw_b"]),
            ("g2", params["g2"]), ("b2", params["b2"]),
            ("g3", params["g3"]), ("b3", params["b3"])]
    segs += [("tap%d" % k, dw9[:, k]) for k in range(9)]
    chunks, offs, off = [], {}, 0
    for name, v in segs:
        v = v.astype(jnp.float32).reshape(-1)
        n = v.shape[0]
        pad = (-n) % 8                               # keep segments 8-aligned
        offs[name] = off
        chunks.append(v)
        if pad:
            chunks.append(jnp.zeros((pad,), jnp.float32))
        off += n + pad
    return jnp.concatenate(chunks).reshape(-1, 1), offs


def _pack_weights(w1, w3):
    """One zero-padded slab holding both 1x1 conv kernels, 8-aligned rows/cols."""
    B, C_in = w1.shape
    C_out, _ = w3.shape
    B_p, C_in_p, C_out_p = _pad8(B), _pad8(C_in), _pad8(C_out)
    cmax = max(C_in_p, B_p)
    slab = jnp.zeros((B_p + C_out_p, cmax), jnp.float32)
    slab = slab.at[:B, :C_in].set(w1.astype(jnp.float32))
    slab = slab.at[B_p:B_p + C_out, :B].set(w3.astype(jnp.float32))
    return slab, B_p                                 # B_p = row offset of w3


def _reflect_masks(H, W):
    """(4, HW) float edge masks (left / right / top / bottom image borders)."""
    HW = H * W
    lane = jnp.arange(HW, dtype=jnp.int32)
    col = lane % W
    return jnp.stack([col == 0, col == W - 1,
                      lane < W, lane >= (H - 1) * W], axis=0).astype(jnp.float32)


# ------------------------------ wrapper ----------------------------------------
def irb_block(x, params, samples_per_step=None):
    """IRB_Block forward. x: (N, C_in, H, W) f32 NCHW -> (N, C_out, H, W)."""
    N, C_in, H, W = x.shape
    B = params["w1"].shape[0]
    C_out = params["w3"].shape[0]
    HW = H * W
    C_in_p = _pad8(C_in)
    shortcut = (C_in == C_out)

    # Samples per grid step: amortize the ~0.35us/step overhead, but keep a
    # >=2-wide "parallel" grid axis so both v7x TensorCores get work.
    if samples_per_step is None:
        samples_per_step = 1 if N <= 2 else 2
    nb = max(1, min(int(samples_per_step), N))
    while N % nb:
        nb -= 1

    x2 = x.reshape(N, C_in, HW).astype(jnp.float32)
    if C_in_p != C_in:        # pad channels to a sublane multiple for the MXU
        x2 = jnp.pad(x2, ((0, 0), (0, C_in_p - C_in), (0, 0)))

    pslab, offs = _pack_params(params)
    wslab, w3_row = _pack_weights(params["w1"], params["w3"])
    masks = _reflect_masks(H, W)

    kernel = functools.partial(
        irb_fused_kernel, H=H, W=W, C_in=C_in, B=B, C_out=C_out,
        shortcut=shortcut, offs=offs, w3_row=w3_row)

    out = pl.pallas_call(
        kernel,
        out_shape=jax.ShapeDtypeStruct((N, C_out, HW), jnp.float32),
        grid=(N // nb,),
        in_specs=[
            pl.BlockSpec((nb, C_in_p, HW), lambda n: (n, 0, 0)),   # activations
            pl.BlockSpec(pslab.shape, lambda n: (0, 0)),           # param slab
            pl.BlockSpec(wslab.shape, lambda n: (0, 0)),           # weight slab
            pl.BlockSpec(masks.shape, lambda n: (0, 0)),           # edge masks
        ],
        out_specs=pl.BlockSpec((nb, C_out, HW), lambda n: (n, 0, 0)),
        compiler_params=pltpu.CompilerParams(
            dimension_semantics=("parallel",),
            vmem_limit_bytes=32 * 1024 * 1024),
    )(x2, pslab, wslab, masks)

    return out.reshape(N, C_out, H, W)


# -------------------------- pure-JAX reference --------------------------------
def irb_block_ref(x, params):
    N, C_in, H, W = x.shape
    C_out = params["w3"].shape[0]
    hi = lax.Precision.HIGHEST

    def gn(y, g, b):  # GroupNorm with 1 group, per sample
        m = jnp.mean(y, axis=(1, 2, 3), keepdims=True)
        v = jnp.mean((y - m) ** 2, axis=(1, 2, 3), keepdims=True)
        return (y - m) / jnp.sqrt(v + EPS) * g[None, :, None, None] + b[None, :, None, None]

    lrelu = lambda y: jnp.where(y >= 0, y, NEG_SLOPE * y)

    # 1x1 conv
    y = jnp.einsum("oc,nchw->nohw", params["w1"], x, precision=hi)
    y = lrelu(gn(y, params["g1"], params["b1"]))
    # depthwise 3x3 with reflect pad
    yp = jnp.pad(y, ((0, 0), (0, 0), (1, 1), (1, 1)), mode="reflect")
    acc = jnp.zeros_like(y)
    for dh in range(3):
        for dw in range(3):
            acc = acc + yp[:, :, dh:dh + H, dw:dw + W] * params["dw_w"][None, :, dh, dw, None, None]
    acc = acc + params["dw_b"][None, :, None, None]
    y = lrelu(gn(acc, params["g2"], params["b2"]))
    # 1x1 conv + GN + residual
    z = jnp.einsum("ob,nbhw->nohw", params["w3"], y, precision=hi)
    z = gn(z, params["g3"], params["b3"])
    if C_in == C_out:
        z = z + x
    return z


# ------------------------------- main ------------------------------------------
if __name__ == "__main__":
    N, C_in, H, W = 2, 4, 16, 16
    expansion_ratio = 2
    C_out = C_in                                  # shortcut path active
    B = int(round(C_in * expansion_ratio))        # bottleneck dim = 8

    key = jax.random.PRNGKey(0)
    ks = jax.random.split(key, 8)
    params = {
        "w1":   jax.random.normal(ks[0], (B, C_in), jnp.float32) * 0.2,
        "g1":   1.0 + 0.1 * jax.random.normal(ks[1], (B,), jnp.float32),
        "b1":   0.05 * jax.random.normal(ks[2], (B,), jnp.float32),
        "dw_w": jax.random.normal(ks[3], (B, 3, 3), jnp.float32) * 0.2,
        "dw_b": 0.05 * jax.random.normal(ks[4], (B,), jnp.float32),
        "g2":   1.0 + 0.1 * jax.random.normal(ks[5], (B,), jnp.float32),
        "b2":   jnp.zeros((B,), jnp.float32),
        "w3":   jax.random.normal(ks[6], (C_out, B), jnp.float32) * 0.2,
        "g3":   jnp.ones((C_out,), jnp.float32),
        "b3":   jnp.zeros((C_out,), jnp.float32),
    }

    x = jax.random.normal(ks[7], (N, C_in, H, W), jnp.float32)

    out = jax.block_until_ready(irb_block(x, params))
    ref = jax.block_until_ready(irb_block_ref(x, params))

    assert out.shape == (N, C_out, H, W)
    # Tolerance allows for the MXU's f32 matmul (multi-pass bf16 decomposition);
    # any structural bug (reflect pad / GN / residual) produces >1e-1 errors.
    err = float(jnp.max(jnp.abs(out - ref)))
    assert jnp.allclose(out, ref, atol=2e-3, rtol=2e-3), err
    print("KERNEL_OK")
</pallas_src>

<mosaic_0001>
module attributes {stable_mosaic.version = 11 : i64} {
  func.func @irb_fused_kernel(%arg0: i32, %arg1: memref<1x8x256xf32, #tpu.memory_space<vmem>>, %arg2: memref<128x1xf32, #tpu.memory_space<vmem>>, %arg3: memref<16x8xf32, #tpu.memory_space<vmem>>, %arg4: memref<4x256xf32, #tpu.memory_space<vmem>>, %arg5: memref<1x4x256xf32, #tpu.memory_space<vmem>>) attributes {dimension_semantics = [#tpu.dimension_semantics<parallel>], iteration_bounds = array<i64: 2>, scalar_prefetch = 0 : i64, scratch_operands = 0 : i64, tpu.core_type = #tpu.core_type<tc>, window_params = [{transform_indices = @transform_0, window_bounds = array<i64: 1, 8, 256>}, {pipeline_mode = #tpu.pipeline_mode<synchronous>, transform_indices = @transform_1, window_bounds = array<i64: 128, 1>}, {pipeline_mode = #tpu.pipeline_mode<synchronous>, transform_indices = @transform_2, window_bounds = array<i64: 16, 8>}, {pipeline_mode = #tpu.pipeline_mode<synchronous>, transform_indices = @transform_3, window_bounds = array<i64: 4, 256>}, {transform_indices = @transform_4, window_bounds = array<i64: 1, 4, 256>}]} {
    %c0 = arith.constant 0 : index
    %c0_0 = arith.constant 0 : index
    %0 = vector.load %arg2[%c0, %c0_0] : memref<128x1xf32, #tpu.memory_space<vmem>>, vector<128x1xf32>
    %c0_1 = arith.constant 0 : index
    %c0_2 = arith.constant 0 : index
    %1 = vector.load %arg3[%c0_1, %c0_2] : memref<16x8xf32, #tpu.memory_space<vmem>>, vector<16x8xf32>
    %2 = vector.extract_strided_slice %1 {offsets = [0, 0], sizes = [8, 8], strides = [1, 1]} : vector<16x8xf32> to vector<8x8xf32>
    %3 = vector.extract_strided_slice %1 {offsets = [8, 0], sizes = [8, 8], strides = [1, 1]} : vector<16x8xf32> to vector<8x8xf32>
    %4 = vector.extract_strided_slice %0 {offsets = [0, 0], sizes = [8, 1], strides = [1, 1]} : vector<128x1xf32> to vector<8x1xf32>
    %5 = vector.extract_strided_slice %0 {offsets = [8, 0], sizes = [8, 1], strides = [1, 1]} : vector<128x1xf32> to vector<8x1xf32>
    %6 = vector.extract_strided_slice %0 {offsets = [24, 0], sizes = [8, 1], strides = [1, 1]} : vector<128x1xf32> to vector<8x1xf32>
    %7 = vector.extract_strided_slice %0 {offsets = [32, 0], sizes = [8, 1], strides = [1, 1]} : vector<128x1xf32> to vector<8x1xf32>
    %8 = vector.extract_strided_slice %0 {offsets = [40, 0], sizes = [4, 1], strides = [1, 1]} : vector<128x1xf32> to vector<4x1xf32>
    %9 = vector.extract_strided_slice %0 {offsets = [48, 0], sizes = [4, 1], strides = [1, 1]} : vector<128x1xf32> to vector<4x1xf32>
    %10 = vector.extract_strided_slice %0 {offsets = [16, 0], sizes = [8, 1], strides = [1, 1]} : vector<128x1xf32> to vector<8x1xf32>
    %11 = vector.extract_strided_slice %0 {offsets = [56, 0], sizes = [8, 1], strides = [1, 1]} : vector<128x1xf32> to vector<8x1xf32>
    %12 = vector.extract_strided_slice %0 {offsets = [64, 0], sizes = [8, 1], strides = [1, 1]} : vector<128x1xf32> to vector<8x1xf32>
    %13 = vector.extract_strided_slice %0 {offsets = [72, 0], sizes = [8, 1], strides = [1, 1]} : vector<128x1xf32> to vector<8x1xf32>
    %14 = vector.extract_strided_slice %0 {offsets = [80, 0], sizes = [8, 1], strides = [1, 1]} : vector<128x1xf32> to vector<8x1xf32>
    %15 = vector.extract_strided_slice %0 {offsets = [88, 0], sizes = [8, 1], strides = [1, 1]} : vector<128x1xf32> to vector<8x1xf32>
    %16 = vector.extract_strided_slice %0 {offsets = [96, 0], sizes = [8, 1], strides = [1, 1]} : vector<128x1xf32> to vector<8x1xf32>
    %17 = vector.extract_strided_slice %0 {offsets = [104, 0], sizes = [8, 1], strides = [1, 1]} : vector<128x1xf32> to vector<8x1xf32>
    %18 = vector.extract_strided_slice %0 {offsets = [112, 0], sizes = [8, 1], strides = [1, 1]} : vector<128x1xf32> to vector<8x1xf32>
    %19 = vector.extract_strided_slice %0 {offsets = [120, 0], sizes = [8, 1], strides = [1, 1]} : vector<128x1xf32> to vector<8x1xf32>
    %c0_3 = arith.constant 0 : index
    %c0_4 = arith.constant 0 : index
    %20 = vector.load %arg4[%c0_3, %c0_4] : memref<4x256xf32, #tpu.memory_space<vmem>>, vector<4x256xf32>
    %21 = vector.extract_strided_slice %20 {offsets = [0, 0], sizes = [1, 256], strides = [1, 1]} : vector<4x256xf32> to vector<1x256xf32>
    %22 = vector.shape_cast %21 : vector<1x256xf32> to vector<1x256xf32>
    %23 = vector.broadcast %22 : vector<1x256xf32> to vector<8x256xf32>
    %cst = arith.constant 5.000000e-01 : f32
    %24 = vector.broadcast %cst : f32 to vector<8x256xf32>
    %25 = arith.cmpf ogt, %23, %24 : vector<8x256xf32>
    %26 = vector.extract_strided_slice %20 {offsets = [1, 0], sizes = [1, 256], strides = [1, 1]} : vector<4x256xf32> to vector<1x256xf32>
    %27 = vector.shape_cast %26 : vector<1x256xf32> to vector<1x256xf32>
    %28 = vector.broadcast %27 : vector<1x256xf32> to vector<8x256xf32>
    %cst_5 = arith.constant 5.000000e-01 : f32
    %29 = vector.broadcast %cst_5 : f32 to vector<8x256xf32>
    %30 = arith.cmpf ogt, %28, %29 : vector<8x256xf32>
    %31 = vector.extract_strided_slice %20 {offsets = [2, 0], sizes = [1, 256], strides = [1, 1]} : vector<4x256xf32> to vector<1x256xf32>
    %32 = vector.shape_cast %31 : vector<1x256xf32> to vector<1x256xf32>
    %33 = vector.broadcast %32 : vector<1x256xf32> to vector<8x256xf32>
    %cst_6 = arith.constant 5.000000e-01 : f32
    %34 = vector.broadcast %cst_6 : f32 to vector<8x256xf32>
    %35 = arith.cmpf ogt, %33, %34 : vector<8x256xf32>
    %36 = vector.extract_strided_slice %20 {offsets = [3, 0], sizes = [1, 256], strides = [1, 1]} : vector<4x256xf32> to vector<1x256xf32>
    %37 = vector.shape_cast %36 : vector<1x256xf32> to vector<1x256xf32>
    %38 = vector.broadcast %37 : vector<1x256xf32> to vector<8x256xf32>
    %cst_7 = arith.constant 5.000000e-01 : f32
    %39 = vector.broadcast %cst_7 : f32 to vector<8x256xf32>
    %40 = arith.cmpf ogt, %38, %39 : vector<8x256xf32>
    %c0_8 = arith.constant 0 : index
    %c0_9 = arith.constant 0 : index
    %c0_10 = arith.constant 0 : index
    %41 = vector.load %arg1[%c0_8, %c0_9, %c0_10] : memref<1x8x256xf32, #tpu.memory_space<vmem>>, vector<1x8x256xf32>
    %42 = vector.shape_cast %41 : vector<1x8x256xf32> to vector<8x256xf32>
    %cst_11 = arith.constant dense<0.000000e+00> : vector<8x256xf32>
    %43 = tpu.matmul %2, %42, %cst_11 {dimension_numbers = #tpu.dot_dimension_numbers<[1], [0], [0], [1], [0, 0, 1, 1], [], []>} : vector<8x8xf32>, vector<8x256xf32>, vector<8x256xf32> -> vector<8x256xf32>
    %44 = vector.shape_cast %43 : vector<8x256xf32> to vector<1x8x256xf32>
    %cst_12 = arith.constant dense<0.000000e+00> : vector<1xf32>
    %45 = vector.multi_reduction <add>, %44, %cst_12 [1, 2] : vector<1x8x256xf32> to vector<1xf32>
    %46 = vector.shape_cast %45 : vector<1xf32> to vector<1x1x1xf32>
    %47 = vector.extract %46[0, 0, 0] : f32 from vector<1x1x1xf32>
    %48 = vector.broadcast %47 : f32 to vector<1x1xf32>
    %cst_13 = arith.constant 2.048000e+03 : f32
    %49 = vector.broadcast %cst_13 : f32 to vector<1x1xf32>
    %50 = arith.divf %48, %49 : vector<1x1xf32>
    %51 = vector.broadcast %50 : vector<1x1xf32> to vector<8x256xf32>
    %52 = arith.subf %43, %51 : vector<8x256xf32>
    %53 = arith.mulf %52, %52 : vector<8x256xf32>
    %54 = vector.shape_cast %53 : vector<8x256xf32> to vector<1x8x256xf32>
    %cst_14 = arith.constant dense<0.000000e+00> : vector<1xf32>
    %55 = vector.multi_reduction <add>, %54, %cst_14 [1, 2] : vector<1x8x256xf32> to vector<1xf32>
    %56 = vector.shape_cast %55 : vector<1xf32> to vector<1x1x1xf32>
    %57 = vector.extract %56[0, 0, 0] : f32 from vector<1x1x1xf32>
    %58 = vector.broadcast %57 : f32 to vector<1x1xf32>
    %cst_15 = arith.constant 2.048000e+03 : f32
    %59 = vector.broadcast %cst_15 : f32 to vector<1x1xf32>
    %60 = arith.divf %58, %59 : vector<1x1xf32>
    %61 = vector.broadcast %50 : vector<1x1xf32> to vector<8x256xf32>
    %62 = arith.subf %43, %61 : vector<8x256xf32>
    %cst_16 = arith.constant 9.99999974E-6 : f32
    %63 = vector.broadcast %cst_16 : f32 to vector<1x1xf32>
    %64 = arith.addf %60, %63 : vector<1x1xf32>
    %65 = math.rsqrt %64 : vector<1x1xf32>
    %66 = vector.broadcast %65 : vector<1x1xf32> to vector<8x256xf32>
    %67 = arith.mulf %62, %66 : vector<8x256xf32>
    %68 = vector.broadcast %4 : vector<8x1xf32> to vector<8x256xf32>
    %69 = arith.mulf %67, %68 : vector<8x256xf32>
    %70 = vector.broadcast %5 : vector<8x1xf32> to vector<8x256xf32>
    %71 = arith.addf %69, %70 : vector<8x256xf32>
    %cst_17 = arith.constant 0.000000e+00 : f32
    %72 = vector.broadcast %cst_17 : f32 to vector<8x256xf32>
    %73 = arith.cmpf oge, %71, %72 : vector<8x256xf32>
    %cst_18 = arith.constant 2.000000e-01 : f32
    %74 = vector.broadcast %cst_18 : f32 to vector<8x256xf32>
    %75 = arith.mulf %74, %71 : vector<8x256xf32>
    %76 = arith.select %73, %71, %75 : vector<8x256xi1>, vector<8x256xf32>
    %77 = vector.shape_cast %10 : vector<8x1xf32> to vector<8x1xf32>
    %78 = vector.broadcast %77 : vector<8x1xf32> to vector<8x256xf32>
    %c240_i32 = arith.constant 240 : i32
    %79 = tpu.dynamic_rotate %76 by %c240_i32 dim 1 : vector<8x256xf32>, i32 -> vector<8x256xf32>
    %c16_i32 = arith.constant 16 : i32
    %80 = tpu.dynamic_rotate %76 by %c16_i32 dim 1 : vector<8x256xf32>, i32 -> vector<8x256xf32>
    %81 = arith.select %35, %79, %80 : vector<8x256xi1>, vector<8x256xf32>
    %c1_i32 = arith.constant 1 : i32
    %82 = tpu.dynamic_rotate %81 by %c1_i32 dim 1 : vector<8x256xf32>, i32 -> vector<8x256xf32>
    %c255_i32 = arith.constant 255 : i32
    %83 = tpu.dynamic_rotate %81 by %c255_i32 dim 1 : vector<8x256xf32>, i32 -> vector<8x256xf32>
    %84 = arith.select %25, %83, %82 : vector<8x256xi1>, vector<8x256xf32>
    %85 = vector.broadcast %11 : vector<8x1xf32> to vector<8x256xf32>
    %86 = arith.mulf %84, %85 : vector<8x256xf32>
    %87 = arith.addf %78, %86 : vector<8x256xf32>
    %88 = vector.broadcast %12 : vector<8x1xf32> to vector<8x256xf32>
    %89 = arith.mulf %81, %88 : vector<8x256xf32>
    %90 = arith.addf %87, %89 : vector<8x256xf32>
    %91 = arith.select %30, %82, %83 : vector<8x256xi1>, vector<8x256xf32>
    %92 = vector.broadcast %13 : vector<8x1xf32> to vector<8x256xf32>
    %93 = arith.mulf %91, %92 : vector<8x256xf32>
    %94 = arith.addf %90, %93 : vector<8x256xf32>
    %c1_i32_19 = arith.constant 1 : i32
    %95 = tpu.dynamic_rotate %76 by %c1_i32_19 dim 1 : vector<8x256xf32>, i32 -> vector<8x256xf32>
    %c255_i32_20 = arith.constant 255 : i32
    %96 = tpu.dynamic_rotate %76 by %c255_i32_20 dim 1 : vector<8x256xf32>, i32 -> vector<8x256xf32>
    %97 = arith.select %25, %96, %95 : vector<8x256xi1>, vector<8x256xf32>
    %98 = vector.broadcast %14 : vector<8x1xf32> to vector<8x256xf32>
    %99 = arith.mulf %97, %98 : vector<8x256xf32>
    %100 = arith.addf %94, %99 : vector<8x256xf32>
    %101 = vector.broadcast %15 : vector<8x1xf32> to vector<8x256xf32>
    %102 = arith.mulf %76, %101 : vector<8x256xf32>
    %103 = arith.addf %100, %102 : vector<8x256xf32>
    %104 = arith.select %30, %95, %96 : vector<8x256xi1>, vector<8x256xf32>
    %105 = vector.broadcast %16 : vector<8x1xf32> to vector<8x256xf32>
    %106 = arith.mulf %104, %105 : vector<8x256xf32>
    %107 = arith.addf %103, %106 : vector<8x256xf32>
    %c16_i32_21 = arith.constant 16 : i32
    %108 = tpu.dynamic_rotate %76 by %c16_i32_21 dim 1 : vector<8x256xf32>, i32 -> vector<8x256xf32>
    %c240_i32_22 = arith.constant 240 : i32
    %109 = tpu.dynamic_rotate %76 by %c240_i32_22 dim 1 : vector<8x256xf32>, i32 -> vector<8x256xf32>
    %110 = arith.select %40, %108, %109 : vector<8x256xi1>, vector<8x256xf32>
    %c1_i32_23 = arith.constant 1 : i32
    %111 = tpu.dynamic_rotate %110 by %c1_i32_23 dim 1 : vector<8x256xf32>, i32 -> vector<8x256xf32>
    %c255_i32_24 = arith.constant 255 : i32
    %112 = tpu.dynamic_rotate %110 by %c255_i32_24 dim 1 : vector<8x256xf32>, i32 -> vector<8x256xf32>
    %113 = arith.select %25, %112, %111 : vector<8x256xi1>, vector<8x256xf32>
    %114 = vector.broadcast %17 : vector<8x1xf32> to vector<8x256xf32>
    %115 = arith.mulf %113, %114 : vector<8x256xf32>
    %116 = arith.addf %107, %115 : vector<8x256xf32>
    %117 = vector.broadcast %18 : vector<8x1xf32> to vector<8x256xf32>
    %118 = arith.mulf %110, %117 : vector<8x256xf32>
    %119 = arith.addf %116, %118 : vector<8x256xf32>
    %120 = arith.select %30, %111, %112 : vector<8x256xi1>, vector<8x256xf32>
    %121 = vector.broadcast %19 : vector<8x1xf32> to vector<8x256xf32>
    %122 = arith.mulf %120, %121 : vector<8x256xf32>
    %123 = arith.addf %119, %122 : vector<8x256xf32>
    %124 = vector.shape_cast %123 : vector<8x256xf32> to vector<1x8x256xf32>
    %cst_25 = arith.constant dense<0.000000e+00> : vector<1xf32>
    %125 = vector.multi_reduction <add>, %124, %cst_25 [1, 2] : vector<1x8x256xf32> to vector<1xf32>
    %126 = vector.shape_cast %125 : vector<1xf32> to vector<1x1x1xf32>
    %127 = vector.extract %126[0, 0, 0] : f32 from vector<1x1x1xf32>
    %128 = vector.broadcast %127 : f32 to vector<1x1xf32>
    %cst_26 = arith.constant 2.048000e+03 : f32
    %129 = vector.broadcast %cst_26 : f32 to vector<1x1xf32>
    %130 = arith.divf %128, %129 : vector<1x1xf32>
    %131 = vector.broadcast %130 : vector<1x1xf32> to vector<8x256xf32>
    %132 = arith.subf %123, %131 : vector<8x256xf32>
    %133 = arith.mulf %132, %132 : vector<8x256xf32>
    %134 = vector.shape_cast %133 : vector<8x256xf32> to vector<1x8x256xf32>
    %cst_27 = arith.constant dense<0.000000e+00> : vector<1xf32>
    %135 = vector.multi_reduction <add>, %134, %cst_27 [1, 2] : vector<1x8x256xf32> to vector<1xf32>
    %136 = vector.shape_cast %135 : vector<1xf32> to vector<1x1x1xf32>
    %137 = vector.extract %136[0, 0, 0] : f32 from vector<1x1x1xf32>
    %138 = vector.broadcast %137 : f32 to vector<1x1xf32>
    %cst_28 = arith.constant 2.048000e+03 : f32
    %139 = vector.broadcast %cst_28 : f32 to vector<1x1xf32>
    %140 = arith.divf %138, %139 : vector<1x1xf32>
    %141 = vector.broadcast %130 : vector<1x1xf32> to vector<8x256xf32>
    %142 = arith.subf %123, %141 : vector<8x256xf32>
    %cst_29 = arith.constant 9.99999974E-6 : f32
    %143 = vector.broadcast %cst_29 : f32 to vector<1x1xf32>
    %144 = arith.addf %140, %143 : vector<1x1xf32>
    %145 = math.rsqrt %144 : vector<1x1xf32>
    %146 = vector.broadcast %145 : vector<1x1xf32> to vector<8x256xf32>
    %147 = arith.mulf %142, %146 : vector<8x256xf32>
    %148 = vector.broadcast %6 : vector<8x1xf32> to vector<8x256xf32>
    %149 = arith.mulf %147, %148 : vector<8x256xf32>
    %150 = vector.broadcast %7 : vector<8x1xf32> to vector<8x256xf32>
    %151 = arith.addf %149, %150 : vector<8x256xf32>
    %cst_30 = arith.constant 0.000000e+00 : f32
    %152 = vector.broadcast %cst_30 : f32 to vector<8x256xf32>
    %153 = arith.cmpf oge, %151, %152 : vector<8x256xf32>
    %cst_31 = arith.constant 2.000000e-01 : f32
    %154 = vector.broadcast %cst_31 : f32 to vector<8x256xf32>
    %155 = arith.mulf %154, %151 : vector<8x256xf32>
    %156 = arith.select %153, %151, %155 : vector<8x256xi1>, vector<8x256xf32>
    %cst_32 = arith.constant dense<0.000000e+00> : vector<8x256xf32>
    %157 = tpu.matmul %3, %156, %cst_32 {dimension_numbers = #tpu.dot_dimension_numbers<[1], [0], [0], [1], [0, 0, 1, 1], [], []>} : vector<8x8xf32>, vector<8x256xf32>, vector<8x256xf32> -> vector<8x256xf32>
    %158 = vector.extract_strided_slice %157 {offsets = [0, 0], sizes = [4, 256], strides = [1, 1]} : vector<8x256xf32> to vector<4x256xf32>
    %159 = vector.shape_cast %158 : vector<4x256xf32> to vector<1x4x256xf32>
    %cst_33 = arith.constant dense<0.000000e+00> : vector<1xf32>
    %160 = vector.multi_reduction <add>, %159, %cst_33 [1, 2] : vector<1x4x256xf32> to vector<1xf32>
    %161 = vector.shape_cast %160 : vector<1xf32> to vector<1x1x1xf32>
    %162 = vector.extract %161[0, 0, 0] : f32 from vector<1x1x1xf32>
    %163 = vector.broadcast %162 : f32 to vector<1x1xf32>
    %cst_34 = arith.constant 1.024000e+03 : f32
    %164 = vector.broadcast %cst_34 : f32 to vector<1x1xf32>
    %165 = arith.divf %163, %164 : vector<1x1xf32>
    %166 = vector.broadcast %165 : vector<1x1xf32> to vector<4x256xf32>
    %167 = arith.subf %158, %166 : vector<4x256xf32>
    %168 = arith.mulf %167, %167 : vector<4x256xf32>
    %169 = vector.shape_cast %168 : vector<4x256xf32> to vector<1x4x256xf32>
    %cst_35 = arith.constant dense<0.000000e+00> : vector<1xf32>
    %170 = vector.multi_reduction <add>, %169, %cst_35 [1, 2] : vector<1x4x256xf32> to vector<1xf32>
    %171 = vector.shape_cast %170 : vector<1xf32> to vector<1x1x1xf32>
    %172 = vector.extract %171[0, 0, 0] : f32 from vector<1x1x1xf32>
    %173 = vector.broadcast %172 : f32 to vector<1x1xf32>
    %cst_36 = arith.constant 1.024000e+03 : f32
    %174 = vector.broadcast %cst_36 : f32 to vector<1x1xf32>
    %175 = arith.divf %173, %174 : vector<1x1xf32>
    %176 = vector.broadcast %165 : vector<1x1xf32> to vector<4x256xf32>
    %177 = arith.subf %158, %176 : vector<4x256xf32>
    %cst_37 = arith.constant 9.99999974E-6 : f32
    %178 = vector.broadcast %cst_37 : f32 to vector<1x1xf32>
    %179 = arith.addf %175, %178 : vector<1x1xf32>
    %180 = math.rsqrt %179 : vector<1x1xf32>
    %181 = vector.broadcast %180 : vector<1x1xf32> to vector<4x256xf32>
    %182 = arith.mulf %177, %181 : vector<4x256xf32>
    %183 = vector.broadcast %8 : vector<4x1xf32> to vector<4x256xf32>
    %184 = arith.mulf %182, %183 : vector<4x256xf32>
    %185 = vector.broadcast %9 : vector<4x1xf32> to vector<4x256xf32>
    %186 = arith.addf %184, %185 : vector<4x256xf32>
    %187 = vector.extract_strided_slice %42 {offsets = [0, 0], sizes = [4, 256], strides = [1, 1]} : vector<8x256xf32> to vector<4x256xf32>
    %188 = arith.addf %186, %187 : vector<4x256xf32>
    %c0_38 = arith.constant 0 : index
    %c0_39 = arith.constant 0 : index
    %c0_40 = arith.constant 0 : index
    %189 = vector.load %arg5[%c0_38, %c0_39, %c0_40] : memref<1x4x256xf32, #tpu.memory_space<vmem>>, vector<1x4x256xf32>
    %190 = vector.shape_cast %189 : vector<1x4x256xf32> to vector<4x256xf32>
    %191 = vector.shape_cast %188 : vector<4x256xf32> to vector<1x4x256xf32>
    tpu.vector_store %arg5[%c0_38, %c0_39, %c0_40], %191 {strides = array<i32>} : memref<1x4x256xf32, #tpu.memory_space<vmem>>, vector<1x4x256xf32>,
    return
  }
  func.func @transform_0(%arg0: i32) -> (i32, i32, i32) {
    %c0_i32 = arith.constant 0 : i32
    %c0_i32_0 = arith.constant 0 : i32
    %c0_i32_1 = arith.constant 0 : i32
    return %arg0, %c0_i32, %c0_i32_0 : i32, i32, i32
  }
  func.func @transform_1(%arg0: i32) -> (i32, i32) {
    %c0_i32 = arith.constant 0 : i32
    %c0_i32_0 = arith.constant 0 : i32
    %c0_i32_1 = arith.constant 0 : i32
    return %c0_i32, %c0_i32_0 : i32, i32
  }
  func.func @transform_2(%arg0: i32) -> (i32, i32) {
    %c0_i32 = arith.constant 0 : i32
    %c0_i32_0 = arith.constant 0 : i32
    %c0_i32_1 = arith.constant 0 : i32
    return %c0_i32, %c0_i32_0 : i32, i32
  }
  func.func @transform_3(%arg0: i32) -> (i32, i32) {
    %c0_i32 = arith.constant 0 : i32
    %c0_i32_0 = arith.constant 0 : i32
    %c0_i32_1 = arith.constant 0 : i32
    return %c0_i32, %c0_i32_0 : i32, i32
  }
  func.func @transform_4(%arg0: i32) -> (i32, i32, i32) {
    %c0_i32 = arith.constant 0 : i32
    %c0_i32_0 = arith.constant 0 : i32
    %c0_i32_1 = arith.constant 0 : i32
    return %arg0, %c0_i32, %c0_i32_0 : i32, i32, i32
  }
}

</mosaic_0001>

<bundles_post_ra>
// kernel: tpu_custom_call.1
= control target key start
LH: loop header
LB: loop body
LE: loop exit
PB: predicated region body
PF: predicated region fallthrough
CT: control target
= control target key end

     0   :  { %9 = vsyncpa [#allocation3], 0  ;;  %s1259_s0 = inlined_call_operand.vmem [shape: f32[2,8,256], index: 0, kind: input, shape index: {}]   ;;  %s1260_s1 = inlined_call_operand.vmem [shape: f32[128,1], index: 1, kind: input, shape index: {}]   ;;  %s1261_s2 = inlined_call_operand.vmem [shape: f32[16,8], index: 2, kind: input, shape index: {}]   ;;  %s1262_s3 = inlined_call_operand.vmem [shape: f32[4,256], index: 3, kind: input, shape index: {}]   ;;  %s1263_s4 = inlined_call_operand.hbm [shape: f32[2,4,256], index: 4, kind: output, shape index: {}]  }
   0x1   :  { %11 = vsyncpa [#allocation3 + $0x1], 0  ;;  %s958_s15 = smov 0   ;;  %s960_s16 = smov 0  }
   0x2   :  { %s962_s17 = smov 0   ;;  %s964_s18 = smov 0  }
   0x3 LB: > { %s979_s19 = sadd.s32 4294967295, %s924_s18   ;;  %s773_s20 = sadd.s32 4294967294, %s924_s18   ;;  %s924_s18 = sphi %s964_s18, %s1269_s18   ;;  %s920_s17 = sphi %s962_s17, %s1268_s17   ;;  %s916_s16 = sphi %s960_s16, %s1267_s16   ;;  %s912_s15 = sphi %s958_s15, %s1266_s15  }
   0x4   : > { %s983_s21 = sadd.s32 1, %s924_s18   ;;  %s113_s22 = sadd.s32 1, %s920_s17 }
   0x5   : > { %s110_s23 = ssub.s32 %s924_s18, %s983_s21  ;;  %p123_p0 = scmp.ne.s32.totalorder %s920_s17, %s916_s16 }
   0x6   : > { %p111_p1 = scmp.eq.s32.totalorder %s110_s23, 0  ;;  %p124_p2 = scmp.eq.s32.totalorder %s979_s19, 1 }
   0x7   : > { %p129_p3 = scmp.ne.s32.totalorder %s916_s16, %s912_s15  ;;  %p130_p4 = scmp.eq.s32.totalorder %s773_s20, 1 }
   0x8   : > { %s994_s24 = scalar_select %p111_p1, %s920_s17, %s113_s22  }
   0x9   : > { %p996_p5 = por %p124_p2, %p123_p0  ;;  %p1000_p6 = por %p130_p4, %p129_p3 }
   0xa   : > { %p776_p7 = scmp.ge.s32.totalorder %s924_s18, 1  ;;  %p165_p8 = scmp.lt.s32.totalorder %s924_s18, 3 }
   0xc   : > { %p166_p9 = pnand %p776_p7, %p165_p8 }
   0xd   : > { %p191_p10 = scmp.lt.s32.totalorder (!%p166_p9), %s979_s19, 1  ;;  %s928_s14 = smov (!%p166_p9), 16  }
   0xe   : > { %169 = sbr.rel (%p166_p9) target bundleno = 1750 (0x6d6), region = 36  ;;  %s929_s20 = smov (!%p166_p9), 112  }
   0xf   : > { %s930_s11 = smov (!%p166_p9), 1   ;;  %s188_s29 = sand.u32 (!%p166_p9), 1, %s916_s16  }
  0x10   : > { %s777_s30 = sshll.u32 (!%p166_p9), %s188_s29, 3 }
  0x11   : > { %s190_s9 = scalar_lea.vmem (!%p166_p9), [#allocation2], %s777_s30 }
  0x13   : > { %s192_s27 = scalar_select %p191_p10, %s979_s19, 1  ;;  %v212_v0 = vld [vmem:[%s1261_s2] sm:$0xff]  ;;  %vm250_vm0 = vcmask 64512   ;;  %v926_v13 = vmov 2048.0   ;;  %v927_v15 = vmov 0   ;;  %v197_v18 = vld [vmem:[%s1260_s1 + $0x8] sm:$0xff] }
  0x14   : > { %852 = vrcp.f32 %v926_v13  ;;  %v196_v14 = vld [vmem:[%s1260_s1] sm:$0xff]  ;;  %849 = vset.pattern.permute.xlu1 %v927_v15  ;;  %851 = vset.pattern.permute.xlu0 %v927_v15  ;;  %v198_v60 = vld [vmem:[%s1260_s1 + $0x10] sm:$0xff]  ;;  %v207_v62 = vld [vmem:[%s1260_s1 + $0x58] sm:$0xff] }
  0x15   : > { %s789_s28 = sshll.u32 %s192_s27, 4  ;;  %344 = vperm.xlu1 %849, %v196_v14   ;;  %850 = vset.pattern.permute.xlu2 %v927_v15  ;;  %v204_v59 = vld [vmem:[%s1260_s1 + $0x40] sm:$0xff]  ;;  %v203_v63 = vld [vmem:[%s1260_s1 + $0x38] sm:$0xff] }
  0x16   : > { %s195_s5 = scalar_lea.vmem %s1259_s0, %s789_s28  ;;  %v208_v61 = vld [vmem:[%s1260_s1 + $0x60] sm:$0xff] }
  0x17   : > { %v1014_v1 = vld [vmem:[%s195_s5] sm:$0xff]  ;;  %v1016_v2 = vld [vmem:[%s195_s5 + $0x8] sm:$0xff]  ;;  %s790_s5 = sshll.u32 %s979_s19, 3  ;;  %s698_s19 = scalar_lea.sflag [#allocation3], %s188_s29 }
  0x18   : > { %269 = vmatpush.msra.mxu0 %v1014_v1  ;;  %289 = vmatpush.msra.mxu1 %v1016_v2  ;;  %s709_s8 = scalar_lea.hbm %s1263_s4, %s790_s5 }
  0x19   : > { %780 = vmatmul.msk.f32.vlgmr.msra.gmra.mxu0 %vm250_vm0, %v212_v0  ;;  %781 = vmatmul.msk.f32.vlgmr.msra.gmra.mxu1 %vm250_vm0, %v212_v0  ;;  %v205_v0 = vld [vmem:[%s1260_s1 + $0x48] sm:$0xff] }
  0x1a   : > { %v853_v16 = vpop.eup %852 }
  0x1b   : > { %v306_v17 = vmul.f32 2048.0, %v853_v16  ;;  %vm310_vm1 = vweird.f32 %v853_v16 }
  0x1d   : > { %v307_v19 = vsub.f32 1.0, %v306_v17  ;;  %351 = vperm.xlu1 %849, %v197_v18  }
  0x1f   : > { %v308_v20 = vmul.f32 %v853_v16, %v307_v19 }
  0x21   : > { %v309_v21 = vadd.f32 %v853_v16, %v308_v20 }
  0x23   : > { %v1028_v22 = vsel %vm310_vm1, %v853_v16, %v309_v21 }
  0x87   : > { %v345_v44 = vpop.permute.xlu1 %344 }
  0x8f   : > { %v352_v52 = vpop.permute.xlu1 %351 }
  0x96   : > { %v271_v3 = vpop.f32.mrf.mxu0  ;;  %v291_v4 = vpop.f32.mrf.mxu1 }
  0x97   : > { %v294_v5 = vadd.f32 %v291_v4, %v271_v3 }
  0x99   : > { %295 = vadd.xlane.f32.xlu0 %v294_v5  ;;  %v214_v5 = vld [vmem:[%s1262_s3] sm:$0xff] }
 0x10c   : > { %v296_v6 = vpop.xlane.xlu0 %295 }
 0x10d   : > { %v297_v7 = vrot.slane %v296_v6, 4 }
 0x10f   : > { %v298_v8 = vadd.f32 %v297_v7, %v296_v6  ;;  %v371_v6 = vlaneseq }
 0x111   : > { %v299_v9 = vrot.slane %v298_v8, 2 }
 0x113   : > { %v300_v10 = vadd.f32 %v299_v9, %v298_v8  ;;  %v241_v8 = vperm.slane %v214_v5, 7  ;;  %v233_v9 = vperm.slane %v214_v5, 6 }
 0x115   : > { %v301_v11 = vrot.slane %v300_v10, 1  ;;  %v237_v13 = vperm.slane %v233_v9, 2 }
 0x117   : > { %v302_v12 = vadd.f32 %v301_v11, %v300_v10  ;;  %v232_v10 = vperm.slane %v214_v5, 2  ;;  %v1072_v11 = vand.u32 127, %v371_v6  ;;  %vm239_vm10 = vcmp.gt.f32.partialorder %v237_v13, 0.5 }
 0x119   : > { %791 = vpush %v302_v12  ;;  %v245_v12 = vperm.slane %v241_v8, 3  ;;  %v236_v14 = vperm.slane %v232_v10, 2  ;;  %vm373_vm7 = vcmp.lt.s32.totalorder %v1072_v11, 112  ;;  %vm380_vm8 = vcmp.lt.s32.totalorder %v1072_v11, 16 }
 0x11a   : > { %vm389_vm13 = vcmp.lt.s32.totalorder %v1072_v11, 1  ;;  %vm396_vm14 = vcmp.lt.s32.totalorder %v1072_v11, 127 }
 0x11b   : > { %vm247_vm9 = vcmp.gt.f32.partialorder %v245_v12, 0.5  ;;  %vm238_vm11 = vcmp.gt.f32.partialorder %v236_v14, 0.5 }
 0x14a   : > { %s792_s12 = spop %791 }
 0x14b   : > { %v304_v23 = vstv %s792_s12  ;;  %s931_s12 = smov 127  }
 0x14c   : > { %v312_v24 = vmul.f32 %v1028_v22, %v304_v23 }
 0x14e   : > { %v313_v25 = vsub.f32 %v271_v3, %v312_v24  ;;  %v314_v26 = vsub.f32 %v291_v4, %v312_v24  ;;  %v206_v3 = vld [vmem:[%s1260_s1 + $0x50] sm:$0xff] }
 0x150   : > { %v315_v27 = vmul.f32 %v313_v25, %v313_v25  ;;  %v316_v28 = vmul.f32 %v314_v26, %v314_v26 }
 0x152   : > { %v317_v29 = vadd.f32 %v316_v28, %v315_v27  ;;  %v209_v28 = vld [vmem:[%s1260_s1 + $0x68] sm:$0xff] }
 0x154   : > { %318 = vadd.xlane.f32.xlu0 %v317_v29 }
 0x1c7   : > { %v319_v30 = vpop.xlane.xlu0 %318 }
 0x1c8   : > { %v320_v31 = vrot.slane %v319_v30, 4 }
 0x1ca   : > { %v321_v32 = vadd.f32 %v320_v31, %v319_v30 }
 0x1cc   : > { %v322_v33 = vrot.slane %v321_v32, 2 }
 0x1ce   : > { %v323_v34 = vadd.f32 %v322_v33, %v321_v32 }
 0x1d0   : > { %v324_v35 = vrot.slane %v323_v34, 1 }
 0x1d2   : > { %v325_v36 = vadd.f32 %v324_v35, %v323_v34 }
 0x1d4   : > { %793 = vpush %v325_v36  ;;  %v216_v36 = vperm.slane %v214_v5, 0 }
 0x205   : > { %s794_s13 = spop %793 }
 0x206   : > { %v327_v37 = vstv %s794_s13 }
 0x207   : > { %v328_v38 = vmul.f32 %v327_v37, %v1028_v22  ;;  %v217_v37 = vperm.slane %v214_v5, 4 }
 0x209   : > { %v329_v39 = vadd.f32 1e-05, %v328_v38  ;;  %v224_v38 = vperm.slane %v214_v5, 1 }
 0x20b   : > { %854 = vrsqrt.f32 %v329_v39  ;;  %vm336_vm3 = vweird.f32 %v329_v39 }
 0x211   : > { %v855_v40 = vpop.eup %854 }
 0x212   : > { %v331_v41 = vmul.f32 %v855_v40, %v329_v39  ;;  %vm337_vm2 = vweird.f32 %v855_v40  ;;  %v225_v39 = vperm.slane %v214_v5, 5 }
 0x213   : > { %vm338_vm4 = vmor %vm336_vm3, %vm337_vm2 }
 0x214   : > { %v332_v42 = vmul.f32 %v855_v40, %v331_v41  ;;  %v210_v41 = vld [vmem:[%s1260_s1 + $0x70] sm:$0xff] }
 0x216   : > { %v333_v43 = vmul.f32 0.5, %v332_v42  ;;  %v1116_v42 = vperm.slane %v216_v36, 0 }
 0x218   : > { %v334_v45 = vsub.f32 1.5, %v333_v43  ;;  %v1118_v43 = vperm.slane %v217_v37, 0  ;;  %vm222_vm15 = vcmp.gt.f32.partialorder %v1116_v42, 0.5 }
 0x21a   : > { %v335_v46 = vmul.f32 %v855_v40, %v334_v45  ;;  %v1122_v45 = vperm.slane %v225_v39, 1  ;;  %vm223_vm1 = vcmp.gt.f32.partialorder %v1118_v43, 0.5 }
 0x21c   : > { %v339_v47 = vsel %vm338_vm4, %v855_v40, %v335_v46  ;;  %vm231_vm3 = vcmp.gt.f32.partialorder %v1122_v45, 0.5 }
 0x21d   : > { %v340_v48 = vmul.f32 %v339_v47, %v313_v25  ;;  %v341_v49 = vmul.f32 %v339_v47, %v314_v26  ;;  %v240_v26 = vperm.slane %v214_v5, 3 }
 0x21f   : > { %v347_v50 = vmul.f32 %v345_v44, %v340_v48  ;;  %v348_v51 = vmul.f32 %v345_v44, %v341_v49  ;;  %v244_v30 = vperm.slane %v240_v26, 3  ;;  %v1120_v44 = vperm.slane %v224_v38, 1 }
 0x221   : > { %v354_v53 = vadd.f32 %v352_v52, %v347_v50  ;;  %v355_v54 = vadd.f32 %v352_v52, %v348_v51  ;;  %vm246_vm12 = vcmp.gt.f32.partialorder %v244_v30, 0.5  ;;  %vm230_vm2 = vcmp.gt.f32.partialorder %v1120_v44, 0.5 }
 0x223   : > { %vm356_vm5 = vcmp.ge.f32.partialorder %v354_v53, 0.0  ;;  %vm357_vm6 = vcmp.ge.f32.partialorder %v355_v54, 0.0  ;;  %v358_v55 = vmul.f32 0.2, %v354_v53  ;;  %v359_v56 = vmul.f32 0.2, %v355_v54 }
 0x225   : > { %v1032_v57 = vsel %vm357_vm6, %v355_v54, %v359_v56  ;;  %v1034_v58 = vsel %vm356_vm5, %v354_v53, %v358_v55  ;;  %v211_v53 = vld [vmem:[%s1260_s1 + $0x78] sm:$0xff] }
 0x226   : > { %378 = vrot.lane.b32.xlu1 %v1032_v57, %s928_s14  ;;  %376 = vrot.lane.b32.xlu0 %v1034_v58, %s928_s14 }
 0x227   : > { %367 = vrot.lane.b32.xlu2 %v1034_v58, %s929_s20 }
 0x22e   : > { %412 = vperm.xlu1 %849, %v204_v59   ;;  %364 = vperm.xlu0 %851, %v198_v60   ;;  %v199_v60 = vld [vmem:[%s1260_s1 + $0x18] sm:$0xff] }
 0x22f   : > { %369 = vrot.lane.b32.xlu2 %v1032_v57, %s929_s20 }
 0x236   : > { %466 = vperm.xlu1 %849, %v208_v61   ;;  %455 = vperm.xlu0 %851, %v207_v62   ;;  %v200_v61 = vld [vmem:[%s1260_s1 + $0x20] sm:$0xff] }
 0x237   : > { %403 = vperm.xlu2 %850, %v203_v63  }
 0x23e   : > { %430 = vrot.lane.b32.xlu1 %v1034_v58, %s930_s11  ;;  %436 = vrot.lane.b32.xlu0 %v1034_v58, %s931_s12 }
 0x23f   : > { %423 = vperm.xlu2 %850, %v205_v0  }
 0x246   : > { %438 = vrot.lane.b32.xlu1 %v1032_v57, %s931_s12 }
 0x247   : > { %446 = vperm.xlu2 %850, %v206_v3  }
 0x24f   : > { %432 = vrot.lane.b32.xlu2 %v1032_v57, %s930_s11 }
 0x281   : > { %v368_v4 = vpop.permute.xlu2 %367 }
 0x289   : > { %v370_v7 = vpop.permute.xlu2 %369 }
 0x28a   : > { %v374_v17 = vsel %vm373_vm7, %v368_v4, %v370_v7  ;;  %v375_v18 = vsel %vm373_vm7, %v370_v7, %v368_v4 }
 0x291   : > { %v1076_v19 = vpop.permute.xlu2 %403 }
 0x298   : > { %v379_v15 = vpop.permute.xlu1 %378  ;;  %v377_v16 = vpop.permute.xlu0 %376 }
 0x299   : > { %v381_v20 = vsel %vm380_vm8, %v377_v16, %v379_v15  ;;  %v382_v21 = vsel %vm380_vm8, %v379_v15, %v377_v16  ;;  %v1095_v29 = vpop.permute.xlu2 %423 }
 0x29a   : > { %v1078_v23 = vsel %vm247_vm9, %v381_v20, %v375_v18  ;;  %v1080_v24 = vsel %vm239_vm10, %v375_v18, %v381_v20  ;;  %v1082_v25 = vsel %vm238_vm11, %v374_v17, %v382_v21  ;;  %v1105_v33 = vsel %vm246_vm12, %v382_v21, %v374_v17 }
 0x29b   : > { %477 = vrot.lane.b32.xlu0 %v1078_v23, %s930_s11  ;;  %387 = vrot.lane.b32.xlu1 %v1080_v24, %s930_s11  ;;  %vm622_vm9 = vcmask 1043456  }
 0x29c   : > { %385 = vrot.lane.b32.xlu2 %v1082_v25, %s930_s11 }
 0x2a0   : > { %v1090_v27 = vpop.permute.xlu1 %412  ;;  %v1099_v31 = vpop.permute.xlu0 %364 }
 0x2a1   : > { %v447_v34 = vpop.permute.xlu2 %446  ;;  %v415_v17 = vmul.f32 %v1090_v27, %v1082_v25  ;;  %v416_v18 = vmul.f32 %v1090_v27, %v1080_v24 }
 0x2a3   : > { %491 = vperm.xlu0 %851, %v209_v28   ;;  %394 = vrot.lane.b32.xlu1 %v1080_v24, %s931_s12 }
 0x2a4   : > { %392 = vrot.lane.b32.xlu2 %v1082_v25, %s931_s12 }
 0x2a8   : > { %v1103_v32 = vpop.permute.xlu1 %466  ;;  %v1111_v35 = vpop.permute.xlu0 %455 }
 0x2a9   : > { %v433_v46 = vpop.permute.xlu2 %432 }
 0x2ab   : > { %481 = vrot.lane.b32.xlu1 %v1105_v33, %s931_s12 }
 0x2ac   : > { %475 = vrot.lane.b32.xlu2 %v1105_v33, %s930_s11  ;;  %s713_s11 = sshll.u32 %s709_s8, 4  ;;  %s714_s11 = int_to_ptr.hbm [resolvable:$true] %s713_s11 }
 0x2b0   : > { %v431_v40 = vpop.permute.xlu1 %430  ;;  %v437_v47 = vpop.permute.xlu0 %436 }
 0x2b1   : > { %v434_v49 = vsel %vm389_vm13, %v431_v40, %v433_v46  ;;  %v435_v50 = vsel %vm389_vm13, %v433_v46, %v431_v40 }
 0x2b3   : > { %500 = vperm.xlu1 %849, %v210_v41  }
 0x2b4   : > { %483 = vrot.lane.b32.xlu2 %v1078_v23, %s931_s12  ;;  %s876_s12 = sshra.s32 %s714_s11, 4  ;;  %s877_s12 = int_to_ptr.hbm [resolvable:$true] %s876_s12 }
 0x2b5   : > { %p883_p0 = scmp.lt.s32.totalorder %s877_s12, %s1263_s4 }
 0x2b8   : > { %v439_v48 = vpop.permute.xlu1 %438 }
 0x2b9   : > { %v440_v51 = vsel %vm396_vm14, %v437_v47, %v439_v48  ;;  %v441_v52 = vsel %vm396_vm14, %v439_v48, %v437_v47  ;;  %v458_v48 = vmul.f32 %v1111_v35, %v1034_v58 }
 0x2ba   : > { %v442_v54 = vsel %vm222_vm15, %v440_v51, %v435_v50  ;;  %v443_v55 = vsel %vm223_vm1, %v441_v52, %v434_v49  ;;  %v462_v56 = vsel %vm230_vm2, %v435_v50, %v440_v51  ;;  %v463_v59 = vsel %vm231_vm3, %v434_v49, %v441_v52 }
 0x2bb   : > { %v449_v37 = vmul.f32 %v447_v34, %v442_v54  ;;  %v450_v38 = vmul.f32 %v447_v34, %v443_v55  ;;  %v459_v49 = vmul.f32 %v1111_v35, %v1032_v57  ;;  %v469_v42 = vmul.f32 %v1103_v32, %v462_v56 }
 0x2bc   : > { %511 = vperm.xlu2 %850, %v211_v53   ;;  %v470_v51 = vmul.f32 %v1103_v32, %v463_v59 }
 0x2c4   : > { %561 = vperm.xlu2 %850, %v199_v60  }
 0x2cc   : > { %568 = vperm.xlu2 %850, %v200_v61  }
 0x2f6   : > { %v386_v62 = vpop.permute.xlu2 %385 }
 0x2fe   : > { %v393_v63 = vpop.permute.xlu2 %392 }
 0x306   : > { %v476_v3 = vpop.permute.xlu2 %475 }
 0x30d   : > { %v388_v0 = vpop.permute.xlu1 %387  ;;  %v478_v16 = vpop.permute.xlu0 %477 }
 0x30e   : > { %v390_v5 = vsel %vm389_vm13, %v386_v62, %v388_v0  ;;  %v391_v6 = vsel %vm389_vm13, %v388_v0, %v386_v62  ;;  %v480_v25 = vsel %vm389_vm13, %v478_v16, %v476_v3  ;;  %v484_v39 = vpop.permute.xlu2 %483 }
 0x315   : > { %v395_v4 = vpop.permute.xlu1 %394  ;;  %v492_v53 = vpop.permute.xlu0 %491 }
 0x316   : > { %v397_v7 = vsel %vm396_vm14, %v393_v63, %v395_v4  ;;  %v398_v8 = vsel %vm396_vm14, %v395_v4, %v393_v63  ;;  %v512_v35 = vpop.permute.xlu2 %511 }
 0x317   : > { %v399_v9 = vsel %vm222_vm15, %v397_v7, %v391_v6  ;;  %v400_v10 = vsel %vm223_vm1, %v398_v8, %v390_v5  ;;  %v419_v12 = vsel %vm230_vm2, %v391_v6, %v397_v7  ;;  %v420_v13 = vsel %vm231_vm3, %v390_v5, %v398_v8 }
 0x318   : > { %v406_v14 = vmul.f32 %v1076_v19, %v399_v9  ;;  %v407_v15 = vmul.f32 %v1076_v19, %v400_v10  ;;  %v426_v30 = vmul.f32 %v1095_v29, %v419_v12  ;;  %v427_v36 = vmul.f32 %v1095_v29, %v420_v13 }
 0x319   : > { %v479_v19 = vsel %vm389_vm13, %v476_v3, %v478_v16 }
 0x31a   : > { %v408_v20 = vadd.f32 %v406_v14, %v1099_v31  ;;  %v409_v21 = vadd.f32 %v407_v15, %v1099_v31 }
 0x31c   : > { %v417_v26 = vadd.f32 %v415_v17, %v408_v20  ;;  %v418_v28 = vadd.f32 %v416_v18, %v409_v21  ;;  %v201_v18 = vld [vmem:[%s1260_s1 + $0x28] sm:$0xff] }
 0x31d   : > { %v482_v24 = vpop.permute.xlu1 %481 }
 0x31e   : > { %v428_v27 = vadd.f32 %v426_v30, %v417_v26  ;;  %v429_v40 = vadd.f32 %v427_v36, %v418_v28  ;;  %v485_v31 = vsel %vm396_vm14, %v482_v24, %v484_v39  ;;  %v486_v41 = vsel %vm396_vm14, %v484_v39, %v482_v24 }
 0x31f   : > { %v487_v29 = vsel %vm222_vm15, %v485_v31, %v480_v25  ;;  %v488_v34 = vsel %vm223_vm1, %v486_v41, %v479_v19  ;;  %v507_v46 = vsel %vm230_vm2, %v480_v25, %v485_v31  ;;  %v508_v47 = vsel %vm231_vm3, %v479_v19, %v486_v41 }
 0x320   : > { %v451_v11 = vadd.f32 %v449_v37, %v428_v27  ;;  %v452_v50 = vadd.f32 %v450_v38, %v429_v40  ;;  %v494_v44 = vmul.f32 %v492_v53, %v487_v29  ;;  %v495_v54 = vmul.f32 %v492_v53, %v488_v34  ;;  %v562_v40 = vpop.permute.xlu2 %561 }
 0x321   : > { %v514_v63 = vmul.f32 %v512_v35, %v507_v46  ;;  %v515_v0 = vmul.f32 %v512_v35, %v508_v47 }
 0x322   : > { %v460_v43 = vadd.f32 %v458_v48, %v451_v11  ;;  %v461_v52 = vadd.f32 %v459_v49, %v452_v50 }
 0x324   : > { %v471_v55 = vadd.f32 %v469_v42, %v460_v43  ;;  %v472_v45 = vadd.f32 %v470_v51, %v461_v52  ;;  %v213_v43 = vld [vmem:[%s1261_s2 + $0x8] sm:$0xff] }
 0x325   : > { %v501_v60 = vpop.permute.xlu1 %500 }
 0x326   : > { %v496_v61 = vadd.f32 %v494_v44, %v471_v55  ;;  %v497_v62 = vadd.f32 %v495_v54, %v472_v45  ;;  %v503_v58 = vmul.f32 %v501_v60, %v1105_v33  ;;  %v504_v57 = vmul.f32 %v501_v60, %v1078_v23 }
 0x328   : > { %v505_v56 = vadd.f32 %v503_v58, %v496_v61  ;;  %v506_v3 = vadd.f32 %v504_v57, %v497_v62  ;;  %v569_v11 = vpop.permute.xlu2 %568 }
 0x32a   : > { %v516_v32 = vadd.f32 %v514_v63, %v505_v56  ;;  %v517_v59 = vadd.f32 %v515_v0, %v506_v3  ;;  %v932_v56 = vmov 1024.0  }
 0x32c   : > { %v518_v4 = vadd.f32 %v517_v59, %v516_v32 }
 0x32e   : > { %519 = vadd.xlane.f32.xlu0 %v518_v4 }
 0x3a1   : > { %v520_v5 = vpop.xlane.xlu0 %519 }
 0x3a2   : > { %v521_v6 = vrot.slane %v520_v5, 4 }
 0x3a4   : > { %v522_v7 = vadd.f32 %v521_v6, %v520_v5 }
 0x3a6   : > { %v523_v8 = vrot.slane %v522_v7, 2 }
 0x3a8   : > { %v524_v9 = vadd.f32 %v523_v8, %v522_v7 }
 0x3aa   : > { %v525_v10 = vrot.slane %v524_v9, 1 }
 0x3ac   : > { %v526_v12 = vadd.f32 %v525_v10, %v524_v9 }
 0x3ae   : > { %795 = vpush %v526_v12 }
 0x3df   : > { %s796_s10 = spop %795 }
 0x3e0   : > { %v528_v33 = vstv %s796_s10  ;;  %s711_s10 = sshll.u32 %s190_s9, 4  ;;  %s712_s10 = int_to_ptr.vmem [resolvable:$true] %s711_s10 }
 0x3e1   : > { %v529_v23 = vmul.f32 %v528_v33, %v1028_v22 }
 0x3e3   : > { %v530_v13 = vsub.f32 %v516_v32, %v529_v23  ;;  %v531_v14 = vsub.f32 %v517_v59, %v529_v23 }
 0x3e5   : > { %v532_v15 = vmul.f32 %v530_v13, %v530_v13  ;;  %v533_v16 = vmul.f32 %v531_v14, %v531_v14 }
 0x3e7   : > { %v534_v17 = vadd.f32 %v533_v16, %v532_v15  ;;  %v202_v15 = vld [vmem:[%s1260_s1 + $0x30] sm:$0xff] }
 0x3e9   : > { %535 = vadd.xlane.f32.xlu1 %v534_v17 }
 0x402   : > { %677 = vperm.xlu1 %849, %v201_v18  }
 0x45c   : > { %v536_v20 = vpop.xlane.xlu1 %535 }
 0x45d   : > { %v537_v21 = vrot.slane %v536_v20, 4 }
 0x45f   : > { %v538_v26 = vadd.f32 %v537_v21, %v536_v20 }
 0x461   : > { %v539_v28 = vrot.slane %v538_v26, 2 }
 0x463   : > { %v540_v30 = vadd.f32 %v539_v28, %v538_v26 }
 0x465   : > { %v541_v36 = vrot.slane %v540_v30, 1 }
 0x467   : > { %v542_v37 = vadd.f32 %v541_v36, %v540_v30 }
 0x469   : > { %797 = vpush %v542_v37 }
 0x49a   : > { %s798_s13 = spop %797 }
 0x49b   : > { %v544_v38 = vstv %s798_s13  ;;  %s878_s13 = scalar_lea.hbm %s877_s12, 8 }
 0x49c   : > { %v545_v19 = vmul.f32 %v544_v38, %v1028_v22  ;;  %p879_p11 = scmp.ne.s32.totalorder %s877_s12, %s878_s13 }
 0x49e   : > { %v546_v25 = vadd.f32 1e-05, %v545_v19  ;;  %p880_p12 = pnand %p879_p11, %p996_p5 }
 0x4a0   : > { %856 = vrsqrt.f32 %v546_v25  ;;  %vm553_vm5 = vweird.f32 %v546_v25  ;;  %p881_p13 = pneg %p880_p12 }
 0x4a1   : > { %858 = vrcp.f32 %v932_v56 }
 0x4a6   : > { %v857_v39 = vpop.eup %856 }
 0x4a7   : > { %v548_v24 = vmul.f32 %v857_v39, %v546_v25  ;;  %vm554_vm4 = vweird.f32 %v857_v39  ;;  %v859_v3 = vpop.eup %858 }
 0x4a8   : > { %vm555_vm6 = vmor %vm553_vm5, %vm554_vm4  ;;  %v637_v32 = vmul.f32 1024.0, %v859_v3 }
 0x4a9   : > { %v549_v27 = vmul.f32 %v857_v39, %v548_v24 }
 0x4aa   : > { %v638_v59 = vsub.f32 1.0, %v637_v32 }
 0x4ab   : > { %v550_v31 = vmul.f32 0.5, %v549_v27 }
 0x4ac   : > { %v639_v4 = vmul.f32 %v859_v3, %v638_v59 }
 0x4ad   : > { %v551_v41 = vsub.f32 1.5, %v550_v31 }
 0x4ae   : > { %v640_v5 = vadd.f32 %v859_v3, %v639_v4 }
 0x4af   : > { %v552_v29 = vmul.f32 %v857_v39, %v551_v41 }
 0x4b1   : > { %v556_v34 = vsel %vm555_vm6, %v857_v39, %v552_v29  ;;  %v678_v29 = vpop.permute.xlu1 %677 }
 0x4b2   : > { %v557_v46 = vmul.f32 %v556_v34, %v530_v13  ;;  %v558_v47 = vmul.f32 %v556_v34, %v531_v14 }
 0x4b4   : > { %v564_v48 = vmul.f32 %v562_v40, %v557_v46  ;;  %v565_v49 = vmul.f32 %v562_v40, %v558_v47 }
 0x4b6   : > { %v571_v50 = vadd.f32 %v569_v11, %v564_v48  ;;  %v572_v22 = vadd.f32 %v569_v11, %v565_v49 }
 0x4b8   : > { %vm573_vm7 = vcmp.ge.f32.partialorder %v571_v50, 0.0  ;;  %v575_v42 = vmul.f32 0.2, %v571_v50  ;;  %vm574_vm8 = vcmp.ge.f32.partialorder %v572_v22, 0.0  ;;  %v576_v51 = vmul.f32 0.2, %v572_v22 }
 0x4ba   : > { %v577_v52 = vsel %vm573_vm7, %v571_v50, %v575_v42  ;;  %v578_v53 = vsel %vm574_vm8, %v572_v22, %v576_v51 }
 0x4bb   : > { %597 = vmatpush.msra.mxu2 %v577_v52  ;;  %617 = vmatpush.msra.mxu3 %v578_v53 }
 0x4bc   : > { %782 = vmatmul.msk.f32.vlgmr.msra.gmra.mxu2 %vm250_vm0, %v213_v43  ;;  %783 = vmatmul.msk.f32.vlgmr.msra.gmra.mxu3 %vm250_vm0, %v213_v43  ;;  %vm641_vm0 = vweird.f32 %v859_v3 }
 0x4bd   : > { %v642_v6 = vsel %vm641_vm0, %v859_v3, %v640_v5 }
 0x53f   : > { %v599_v44 = vpop.f32.mrf.mxu2  ;;  %v619_v54 = vpop.f32.mrf.mxu3 }
 0x540   : > { %v623_v55 = vsel %vm622_vm9, %v599_v44, 0.0  ;;  %v624_v45 = vsel %vm622_vm9, %v619_v54, 0.0 }
 0x541   : > { %v625_v60 = vadd.f32 %v624_v45, %v623_v55 }
 0x543   : > { %626 = vadd.xlane.f32.xlu2 %v625_v60 }
 0x5b6   : > { %v627_v61 = vpop.xlane.xlu2 %626 }
 0x5b7   : > { %v628_v62 = vrot.slane %v627_v61, 4 }
 0x5b9   : > { %v629_v58 = vadd.f32 %v628_v62, %v627_v61 }
 0x5bb   : > { %v630_v57 = vrot.slane %v629_v58, 2 }
 0x5bd   : > { %v631_v35 = vadd.f32 %v630_v57, %v629_v58 }
 0x5bf   : > { %v632_v63 = vrot.slane %v631_v35, 1 }
 0x5c1   : > { %v633_v0 = vadd.f32 %v632_v63, %v631_v35 }
 0x5c3   : > { %799 = vpush %v633_v0 }
 0x5f4   : > { %s800_s22 = spop %799 }
 0x5f5   : > { %v635_v7 = vstv %s800_s22  ;;  %s882_s22 = scalar_lea.hbm %s1263_s4, 16 }
 0x5f6   : > { %v643_v8 = vmul.f32 %v642_v6, %v635_v7  ;;  %p884_p1 = scmp.lt.s32.totalorder %s882_s22, %s878_s13 }
 0x5f8   : > { %v644_v9 = vsub.f32 %v599_v44, %v643_v8  ;;  %v645_v10 = vsub.f32 %v619_v54, %v643_v8  ;;  %p885_p2 = por %p884_p1, %p883_p0 }
 0x5fa   : > { %v646_v12 = vmul.f32 %v644_v9, %v644_v9  ;;  %v647_v33 = vmul.f32 %v645_v10, %v645_v10  ;;  %p886_p3 = pnand %p885_p2, %p881_p13 }
 0x5fc   : > { %v648_v23 = vsel %vm622_vm9, %v646_v12, 0.0  ;;  %v649_v13 = vsel %vm622_vm9, %v647_v33, 0.0 }
 0x5fd   : > { %v650_v14 = vadd.f32 %v649_v13, %v648_v23 }
 0x5ff   : > { %651 = vadd.xlane.f32.xlu0 %v650_v14 }
 0x613   : > { %684 = vperm.xlu0 %851, %v202_v15  }
 0x672   : > { %v652_v16 = vpop.xlane.xlu0 %651 }
 0x673   : > { %v653_v17 = vrot.slane %v652_v16, 4 }
 0x675   : > { %v654_v18 = vadd.f32 %v653_v17, %v652_v16 }
 0x677   : > { %v655_v20 = vrot.slane %v654_v18, 2 }
 0x679   : > { %v656_v21 = vadd.f32 %v655_v20, %v654_v18 }
 0x67b   : > { %v657_v26 = vrot.slane %v656_v21, 1 }
 0x67d   : > { %v658_v28 = vadd.f32 %v657_v26, %v656_v21 }
 0x67f   : > { %801 = vpush %v658_v28 }
 0x685   : > { %v685_v47 = vpop.permute.xlu0 %684 }
 0x6b0   : > { %s802_s28 = spop %801 }
 0x6b1   : > { %v660_v30 = vstv %s802_s28 }
 0x6b2   : > { %v661_v36 = vmul.f32 %v660_v30, %v642_v6 }
 0x6b4   : > { %v662_v37 = vadd.f32 1e-05, %v661_v36 }
 0x6b6   : > { %860 = vrsqrt.f32 %v662_v37  ;;  %vm669_vm11 = vweird.f32 %v662_v37 }
 0x6bc   : > { %v861_v38 = vpop.eup %860 }
 0x6bd   : > { %v664_v19 = vmul.f32 %v861_v38, %v662_v37  ;;  %vm670_vm10 = vweird.f32 %v861_v38 }
 0x6be   : > { %vm671_vm12 = vmor %vm669_vm11, %vm670_vm10 }
 0x6bf   : > { %v665_v25 = vmul.f32 %v861_v38, %v664_v19 }
 0x6c1   : > { %v666_v39 = vmul.f32 0.5, %v665_v25 }
 0x6c3   : > { %v667_v24 = vsub.f32 1.5, %v666_v39 }
 0x6c5   : > { %v668_v27 = vmul.f32 %v861_v38, %v667_v24 }
 0x6c7   : > { %v672_v40 = vsel %vm671_vm12, %v861_v38, %v668_v27 }
 0x6c8   : > { %v673_v31 = vmul.f32 %v672_v40, %v644_v9  ;;  %v674_v41 = vmul.f32 %v672_v40, %v645_v10 }
 0x6ca   : > { %v680_v34 = vmul.f32 %v678_v29, %v673_v31  ;;  %v681_v46 = vmul.f32 %v678_v29, %v674_v41 }
 0x6cc   : > { %v687_v48 = vadd.f32 %v685_v47, %v680_v34  ;;  %v688_v49 = vadd.f32 %v685_v47, %v681_v46 }
 0x6ce   : > { %v690_v11 = vadd.f32 %v688_v49, %v1016_v2  ;;  %v689_v50 = vadd.f32 %v687_v48, %v1014_v1 }
 0x6d0   : > { %v693_v22 = vrot.slane %v690_v11, 4 }
 0x6d2   : > { %v694_v42 = vsel %vm622_vm9, %v689_v50, %v693_v22 }
 0x6d3   : > { %696 = vst [vmem:[%s190_s9] sm:$0xff] %v694_v42 }
 0x6d4   : > { %889 = shalt.err (!%p886_p3)
}
 0x6d5   : > { %803 = dma.vmem_to_hbm [thread:$0]  (%p996_p5), %s712_s10, 128, %s714_s11, %s698_s19  }
 0x6d6 PF: > { %p809_p4 = scmp.ge.s32.totalorder %s924_s18, 2  ;;  %s725_s28 = sand.u32 1, %s912_s15  }
 0x6d7   : > { %s726_s29 = scalar_lea.sflag [#allocation3], %s725_s28 }
 0x6d8   : > { %p806_p7 = pnand %p809_p4, %p1000_p6 }
 0x6da   : > { %p807_p8 = pneg %p806_p7 }
 0x6dc   : > { %907 = dma.done.wait (%p807_p8), %s726_s29, 128  }
 0x6dd   : > { %909 = vsyncadd (%p807_p8), %s726_s29, 4294967168  ;;  %p14_p9 = scmp.ge.s32.totalorder %s983_s21, 4   ;;  %s1266_s15 = smov %s916_s16 }
 0x6de   : > { %s1267_s16 = smov %s920_s17  ;;  %s1268_s17 = smov %s994_s24 }
 0x6df   : > { %s1269_s18 = smov %s983_s21  ;;  %16 = sbr.rel (!%p14_p9) target bundleno = 3 (0x3), region = 71 }
 0x6e4   :  { %732 = vsyncpa [#allocation3], 1 }
 0x6e5   :  { %734 = vsyncpa [#allocation3 + $0x1], 1 }

</bundles_post_ra>
